<compile_context>
chip_gen: v7x
topology: tpu7x:2x2x1
jax: 0.10.0
libtpu: 0.0.40
codegen_flags: <defaults>
</compile_context>

<pallas_src>
import functools
import numpy as np
import jax
import jax.numpy as jnp
from jax import lax
from jax.experimental import pallas as pl
from jax.experimental.pallas import tpu as pltpu

LANES = 128
_SUB_ROWS = 8                # per-chunk sublane depth: accumulators stay in vregs
_MAX_ROWS_PER_TILE = 512     # 512 rows x 128 lanes = 64K pixels per tile
_CLASS_UNROLL_LIMIT = 32     # above this, walk classes with a partially-unrolled fori_loop


def _make_pixel_ce_kernel(*, num_classes, ignore_lb, rows_tile, sub_rows,
                          rows_total, thresh_val):
    """Kernel factory.

    Block shapes seen by the kernel:
      logits_ref: (1, C, rows_tile, 128)  native dtype
      tgt_ref:    (1, rows_tile, 128)     int32
      loss_ref:   (1, rows_tile, 128)     f32
      stats_ref:  (1, 1, 3*sub_rows, 128) f32   [cnt_valid | cnt_above | sum_above] partials
    """
    n_chunks = rows_tile // sub_rows
    needs_row_mask = (rows_total % rows_tile) != 0   # ragged last row-tile of the grid

    def kernel(logits_ref, tgt_ref, loss_ref, stats_ref):
        tile_row0 = pl.program_id(0) * rows_tile

        def chunk(r0, cv, ca, sa):
            t = tgt_ref[0, pl.ds(r0, sub_rows), :]
            valid = t != ignore_lb
            if needs_row_mask:
                # Mask rows of the (possibly) overhanging last grid block instead of padding
                # the logits in HBM.
                row_idx = (tile_row0 + r0
                           + lax.broadcasted_iota(jnp.int32, (sub_rows, LANES), 0))
                valid = jnp.logical_and(valid, row_idx < rows_total)

            def slab(c):
                # Native-dtype load, f32 math (keeps bf16 inputs cheap on the HBM side).
                return logits_ref[0, c, pl.ds(r0, sub_rows), :].astype(jnp.float32)

            if num_classes <= _CLASS_UNROLL_LIMIT:
                # pass 1: running max over classes (static unroll, pure VPU)
                m = slab(0)
                for c in range(1, num_classes):
                    m = jnp.maximum(m, slab(c))
                # pass 2: sum of exp(x_c - m) and the target-class logit via select
                s = jnp.zeros_like(m)
                xt = jnp.zeros_like(m)
                for c in range(num_classes):
                    x_c = slab(c)
                    s = s + jnp.exp(x_c - m)
                    xt = jnp.where(t == c, x_c, xt)
            else:
                # Large class counts (e.g. ADE20K's 150): partial unroll avoids a huge
                # straight-line body while keeping LLO scheduling visibility.
                m = lax.fori_loop(1, num_classes,
                                  lambda c, acc: jnp.maximum(acc, slab(c)),
                                  slab(0), unroll=4)

                def sum_body(c, carry):
                    s, xt = carry
                    x_c = slab(c)
                    return s + jnp.exp(x_c - m), jnp.where(t == c, x_c, xt)

                s, xt = lax.fori_loop(0, num_classes, sum_body,
                                      (jnp.zeros_like(m), jnp.zeros_like(m)),
                                      unroll=4)

            # CE = logsumexp(x) - x_target ; ignore_index / out-of-range rows contribute 0
            loss = jnp.where(valid, m + jnp.log(s) - xt, 0.0)
            loss_ref[0, pl.ds(r0, sub_rows), :] = loss

            # Fused OHEM threshold statistics (avoids re-reading loss/labels from HBM).
            above = loss > thresh_val
            cv = cv + valid.astype(jnp.float32)
            ca = ca + above.astype(jnp.float32)
            sa = sa + jnp.where(above, loss, 0.0)
            return cv, ca, sa

        zeros = jnp.zeros((sub_rows, LANES), jnp.float32)
        if n_chunks == 1:
            cv, ca, sa = chunk(0, zeros, zeros, zeros)
        else:
            def body(ci, carry):
                r0 = pl.multiple_of(ci * sub_rows, sub_rows)
                return chunk(r0, *carry)
            cv, ca, sa = lax.fori_loop(0, n_chunks, body, (zeros, zeros, zeros))

        stats_ref[0, 0] = jnp.concatenate([cv, ca, sa], axis=0)

    return kernel


def _pixel_ce_pallas(logits_ncrl, labels_nrl, *, ignore_lb, rows_tile, sub_rows,
                     thresh_val, vmem_limit_bytes):
    N, C, R, L = logits_ncrl.shape
    num_row_tiles = -(-R // rows_tile)
    kernel = _make_pixel_ce_kernel(
        num_classes=C, ignore_lb=ignore_lb, rows_tile=rows_tile,
        sub_rows=sub_rows, rows_total=R, thresh_val=thresh_val)
    return pl.pallas_call(
        kernel,
        out_shape=(
            jax.ShapeDtypeStruct((N, R, L), jnp.float32),                       # loss map
            jax.ShapeDtypeStruct((N, num_row_tiles, 3 * sub_rows, L), jnp.float32),  # stats
        ),
        grid_spec=pltpu.PrefetchScalarGridSpec(
            num_scalar_prefetch=0,
            # Row-tile axis first so megacore chips shard the long axis, not the tiny batch.
            grid=(num_row_tiles, N),
            in_specs=[
                pl.BlockSpec((1, C, rows_tile, L), lambda r, i: (i, 0, r, 0)),
                pl.BlockSpec((1, rows_tile, L), lambda r, i: (i, r, 0)),
            ],
            out_specs=[
                pl.BlockSpec((1, rows_tile, L), lambda r, i: (i, r, 0)),
                pl.BlockSpec((1, 1, 3 * sub_rows, L), lambda r, i: (i, r, 0, 0)),
            ],
        ),
        compiler_params=pltpu.CompilerParams(
            dimension_semantics=("parallel", "parallel"),
            vmem_limit_bytes=vmem_limit_bytes,
        ),
    )(logits_ncrl, labels_nrl)


def _tile_rows(num_classes, logits_itemsize, rows, max_rows_per_tile):
    """Chip-aware tile sizing: double-buffered working set stays well under the VMEM limit."""
    try:
        vmem_cap = int(pltpu.get_tpu_info().vmem_capacity_bytes)
    except Exception:
        vmem_cap = 64 * 1024 * 1024            # conservative (v7x-sized) fallback
    vmem_limit = min((vmem_cap * 3) // 4, 96 * 1024 * 1024)
    # Bytes of VMEM per pixel-row (128 pixels): logits in + labels in + loss out.
    per_row = LANES * (num_classes * logits_itemsize + 4 + 4)
    # Pipeline double-buffers each block; keep 2x block <= ~5/8 of the scoped limit.
    rows_budget = max(_SUB_ROWS, (vmem_limit * 5 // 16) // per_row)
    rows_tile = min(rows, rows_budget, _MAX_ROWS_PER_TILE, max_rows_per_tile)
    if rows_tile < rows:
        rows_tile = max(_SUB_ROWS, (rows_tile // _SUB_ROWS) * _SUB_ROWS)
    sub_rows = _SUB_ROWS if rows_tile % _SUB_ROWS == 0 else rows_tile
    return rows_tile, sub_rows, vmem_limit


def ohem_ce_loss(logits_nchw, labels_nhw, thresh, ignore_lb=255,
                 max_rows_per_tile=_MAX_ROWS_PER_TILE):
    """OhemCELoss.forward: logits (N,C,H,W) any float dtype, labels (N,H,W) int,
    thresh a static Python float in (0,1) (as in the module's constructor)."""
    N, C, H, W = logits_nchw.shape
    HW = H * W
    thresh_val = float(-np.log(float(thresh)))

    pad = (-HW) % LANES
    logits_flat = logits_nchw.reshape(N, C, HW)
    labels_flat = labels_nhw.reshape(N, HW).astype(jnp.int32)
    if pad:
        # TODO(synk): H*W not a multiple of 128 forces one padded copy of the logits; normal
        # segmentation crops hit the zero-copy path below.
        logits_flat = jnp.pad(logits_flat, ((0, 0), (0, 0), (0, pad)))
        labels_flat = jnp.pad(labels_flat, ((0, 0), (0, pad)), constant_values=ignore_lb)
    rows = (HW + pad) // LANES

    # Metadata-only reshapes (no cast, no copy): pixels fill sublanes AND lanes.
    logits_ncrl = logits_flat.reshape(N, C, rows, LANES)
    labels_nrl = labels_flat.reshape(N, rows, LANES)

    itemsize = jnp.dtype(logits_nchw.dtype).itemsize
    rows_tile, sub_rows, vmem_limit = _tile_rows(C, itemsize, rows, max_rows_per_tile)

    loss_map, stats = _pixel_ce_pallas(
        logits_ncrl, labels_nrl, ignore_lb=ignore_lb, rows_tile=rows_tile,
        sub_rows=sub_rows, thresh_val=thresh_val, vmem_limit_bytes=vmem_limit)

    # ---- reduce the fused per-tile statistics (tiny) ----
    num_row_tiles = -(-rows // rows_tile)
    stats_r = stats.reshape(N, num_row_tiles, 3, sub_rows, LANES)
    cnt_valid = jnp.sum(stats_r[:, :, 0].astype(jnp.int32))
    cnt_above = jnp.sum(stats_r[:, :, 1].astype(jnp.int32))
    sum_above = jnp.sum(stats_r[:, :, 2])
    n_min = cnt_valid // 16

    # ---- OHEM selection ----
    # Common branch never touches the loss map; the dynamic-n_min top-k fallback only runs
    # when needed and uses a static-k lax.top_k instead of a full sort.
    # TODO(synk): the data-dependent top-k itself stays in plain JAX (no clean Pallas form).
    k_max = max(1, (N * rows * LANES) // 16)   # static upper bound for n_min

    def _mean_above(_):
        # Matches torch.mean(): 0/0 -> NaN in the degenerate all-ignored case.
        return sum_above / cnt_above.astype(jnp.float32)

    def _mean_topk(_):
        top_vals, _ = lax.top_k(loss_map.reshape(-1), k_max)
        idx = lax.iota(jnp.int32, k_max)
        return (jnp.sum(jnp.where(idx < n_min, top_vals, 0.0))
                / n_min.astype(jnp.float32))

    return lax.cond(cnt_above < n_min, _mean_topk, _mean_above, 0)


def _reference_numpy(logits, labels, thresh, ignore_lb=255):
    x = np.asarray(logits, dtype=np.float64)           # (N, C, H, W)
    t = np.asarray(labels).astype(np.int64)            # (N, H, W)
    m = x.max(axis=1, keepdims=True)
    logp = x - m - np.log(np.exp(x - m).sum(axis=1, keepdims=True))
    valid = t != ignore_lb
    tv = np.where(valid, t, 0)
    lp = np.take_along_axis(logp, tv[:, None], axis=1)[:, 0]
    loss = np.where(valid, -lp, 0.0).reshape(-1)
    n_min = int(valid.sum()) // 16
    th = -np.log(thresh)
    hard = loss[loss > th]
    if hard.size < n_min:
        hard = np.sort(loss)[::-1][:n_min]
    return float(hard.mean())


if __name__ == "__main__":
    def make_case(key, N, C, H, W, ignore_prob=0.1, dtype=jnp.float32):
        kx, kt, km = jax.random.split(key, 3)
        x = jax.random.normal(kx, (N, C, H, W), dtype=jnp.float32).astype(dtype)
        t = jax.random.randint(kt, (N, H, W), 0, C, dtype=jnp.int32)
        t = jnp.where(jax.random.uniform(km, (N, H, W)) < ignore_prob, 255, t)
        return x, t

    # 1) Spec shape; thresh=0.7 exercises the loss>thresh branch, 0.05 the top-k fallback.
    x, t = make_case(jax.random.PRNGKey(0), 2, 4, 16, 16)
    for thresh in (0.7, 0.05):
        got = float(jax.block_until_ready(ohem_ce_loss(x, t, thresh)))
        ref = _reference_numpy(np.asarray(x), np.asarray(t), thresh)
        assert np.allclose(got, ref, rtol=1e-4, atol=1e-5), ("case1", thresh, got, ref)

    # 2) Multi-tile grid + ragged row tail (rows=18, rows_tile=16) + chunked class loop.
    x2, t2 = make_case(jax.random.PRNGKey(1), 1, 5, 48, 48)
    for thresh in (0.6, 0.02):
        got = float(jax.block_until_ready(
            ohem_ce_loss(x2, t2, thresh, max_rows_per_tile=16)))
        ref = _reference_numpy(np.asarray(x2), np.asarray(t2), thresh)
        assert np.allclose(got, ref, rtol=1e-4, atol=1e-5), ("case2", thresh, got, ref)

    # 3) Native bf16 logits (kernel casts each class slab to f32).
    x3, t3 = make_case(jax.random.PRNGKey(2), 2, 4, 16, 16, dtype=jnp.bfloat16)
    got = float(jax.block_until_ready(ohem_ce_loss(x3, t3, 0.7)))
    ref = _reference_numpy(np.asarray(x3.astype(jnp.float32)), np.asarray(t3), 0.7)
    assert np.allclose(got, ref, rtol=1e-3, atol=1e-4), ("case3", got, ref)

    # 4) H*W not a multiple of 128 -> cold padded path.
    x4, t4 = make_case(jax.random.PRNGKey(3), 1, 3, 10, 12)
    got = float(jax.block_until_ready(ohem_ce_loss(x4, t4, 0.5)))
    ref = _reference_numpy(np.asarray(x4), np.asarray(t4), 0.5)
    assert np.allclose(got, ref, rtol=1e-4, atol=1e-5), ("case4", got, ref)

    print("KERNEL_OK")
</pallas_src>

<mosaic_0001>
module attributes {stable_mosaic.version = 11 : i64} {
  func.func @kernel(%arg0: i32, %arg1: i32, %arg2: memref<1x4x2x128xf32, #tpu.memory_space<vmem>>, %arg3: memref<1x2x128xi32, #tpu.memory_space<vmem>>, %arg4: memref<1x2x128xf32, #tpu.memory_space<vmem>>, %arg5: memref<1x1x6x128xf32, #tpu.memory_space<vmem>>) attributes {dimension_semantics = [#tpu.dimension_semantics<parallel>, #tpu.dimension_semantics<parallel>], iteration_bounds = array<i64: 1, 2>, scalar_prefetch = 0 : i64, scratch_operands = 0 : i64, tpu.core_type = #tpu.core_type<tc>, window_params = [{transform_indices = @transform_0, window_bounds = array<i64: 1, 4, 2, 128>}, {transform_indices = @transform_1, window_bounds = array<i64: 1, 2, 128>}, {transform_indices = @transform_2, window_bounds = array<i64: 1, 2, 128>}, {transform_indices = @transform_3, window_bounds = array<i64: 1, 1, 6, 128>}]} {
    %cst = arith.constant 0.000000e+00 : f32
    %0 = vector.broadcast %cst : f32 to vector<2x128xf32>
    %c0 = arith.constant 0 : index
    %c0_0 = arith.constant 0 : index
    %c0_1 = arith.constant 0 : index
    %1 = vector.load %arg3[%c0, %c0_0, %c0_1] : memref<1x2x128xi32, #tpu.memory_space<vmem>>, vector<1x2x128xi32>
    %2 = vector.shape_cast %1 : vector<1x2x128xi32> to vector<2x128xi32>
    %c255_i32 = arith.constant 255 : i32
    %3 = vector.broadcast %c255_i32 : i32 to vector<2x128xi32>
    %4 = arith.cmpi ne, %2, %3 : vector<2x128xi32>
    %c0_2 = arith.constant 0 : index
    %c0_3 = arith.constant 0 : index
    %c0_4 = arith.constant 0 : index
    %c0_5 = arith.constant 0 : index
    %5 = vector.load %arg2[%c0_2, %c0_3, %c0_4, %c0_5] : memref<1x4x2x128xf32, #tpu.memory_space<vmem>>, vector<1x1x2x128xf32>
    %6 = vector.shape_cast %5 : vector<1x1x2x128xf32> to vector<2x128xf32>
    %c0_6 = arith.constant 0 : index
    %c1 = arith.constant 1 : index
    %c0_7 = arith.constant 0 : index
    %c0_8 = arith.constant 0 : index
    %7 = vector.load %arg2[%c0_6, %c1, %c0_7, %c0_8] : memref<1x4x2x128xf32, #tpu.memory_space<vmem>>, vector<1x1x2x128xf32>
    %8 = vector.shape_cast %7 : vector<1x1x2x128xf32> to vector<2x128xf32>
    %9 = arith.maximumf %6, %8 : vector<2x128xf32>
    %c0_9 = arith.constant 0 : index
    %c2 = arith.constant 2 : index
    %c0_10 = arith.constant 0 : index
    %c0_11 = arith.constant 0 : index
    %10 = vector.load %arg2[%c0_9, %c2, %c0_10, %c0_11] : memref<1x4x2x128xf32, #tpu.memory_space<vmem>>, vector<1x1x2x128xf32>
    %11 = vector.shape_cast %10 : vector<1x1x2x128xf32> to vector<2x128xf32>
    %12 = arith.maximumf %9, %11 : vector<2x128xf32>
    %c0_12 = arith.constant 0 : index
    %c3 = arith.constant 3 : index
    %c0_13 = arith.constant 0 : index
    %c0_14 = arith.constant 0 : index
    %13 = vector.load %arg2[%c0_12, %c3, %c0_13, %c0_14] : memref<1x4x2x128xf32, #tpu.memory_space<vmem>>, vector<1x1x2x128xf32>
    %14 = vector.shape_cast %13 : vector<1x1x2x128xf32> to vector<2x128xf32>
    %15 = arith.maximumf %12, %14 : vector<2x128xf32>
    %cst_15 = arith.constant 0.000000e+00 : f32
    %16 = vector.broadcast %cst_15 : f32 to vector<2x128xf32>
    %cst_16 = arith.constant 0.000000e+00 : f32
    %17 = vector.broadcast %cst_16 : f32 to vector<2x128xf32>
    %c0_17 = arith.constant 0 : index
    %c0_18 = arith.constant 0 : index
    %c0_19 = arith.constant 0 : index
    %c0_20 = arith.constant 0 : index
    %18 = vector.load %arg2[%c0_17, %c0_18, %c0_19, %c0_20] : memref<1x4x2x128xf32, #tpu.memory_space<vmem>>, vector<1x1x2x128xf32>
    %19 = vector.shape_cast %18 : vector<1x1x2x128xf32> to vector<2x128xf32>
    %20 = arith.subf %19, %15 : vector<2x128xf32>
    %21 = math.exp %20 : vector<2x128xf32>
    %22 = arith.addf %16, %21 : vector<2x128xf32>
    %c0_i32 = arith.constant 0 : i32
    %23 = vector.broadcast %c0_i32 : i32 to vector<2x128xi32>
    %24 = arith.cmpi eq, %2, %23 : vector<2x128xi32>
    %25 = arith.select %24, %19, %17 : vector<2x128xi1>, vector<2x128xf32>
    %c0_21 = arith.constant 0 : index
    %c1_22 = arith.constant 1 : index
    %c0_23 = arith.constant 0 : index
    %c0_24 = arith.constant 0 : index
    %26 = vector.load %arg2[%c0_21, %c1_22, %c0_23, %c0_24] : memref<1x4x2x128xf32, #tpu.memory_space<vmem>>, vector<1x1x2x128xf32>
    %27 = vector.shape_cast %26 : vector<1x1x2x128xf32> to vector<2x128xf32>
    %28 = arith.subf %27, %15 : vector<2x128xf32>
    %29 = math.exp %28 : vector<2x128xf32>
    %30 = arith.addf %22, %29 : vector<2x128xf32>
    %c1_i32 = arith.constant 1 : i32
    %31 = vector.broadcast %c1_i32 : i32 to vector<2x128xi32>
    %32 = arith.cmpi eq, %2, %31 : vector<2x128xi32>
    %33 = arith.select %32, %27, %25 : vector<2x128xi1>, vector<2x128xf32>
    %c0_25 = arith.constant 0 : index
    %c2_26 = arith.constant 2 : index
    %c0_27 = arith.constant 0 : index
    %c0_28 = arith.constant 0 : index
    %34 = vector.load %arg2[%c0_25, %c2_26, %c0_27, %c0_28] : memref<1x4x2x128xf32, #tpu.memory_space<vmem>>, vector<1x1x2x128xf32>
    %35 = vector.shape_cast %34 : vector<1x1x2x128xf32> to vector<2x128xf32>
    %36 = arith.subf %35, %15 : vector<2x128xf32>
    %37 = math.exp %36 : vector<2x128xf32>
    %38 = arith.addf %30, %37 : vector<2x128xf32>
    %c2_i32 = arith.constant 2 : i32
    %39 = vector.broadcast %c2_i32 : i32 to vector<2x128xi32>
    %40 = arith.cmpi eq, %2, %39 : vector<2x128xi32>
    %41 = arith.select %40, %35, %33 : vector<2x128xi1>, vector<2x128xf32>
    %c0_29 = arith.constant 0 : index
    %c3_30 = arith.constant 3 : index
    %c0_31 = arith.constant 0 : index
    %c0_32 = arith.constant 0 : index
    %42 = vector.load %arg2[%c0_29, %c3_30, %c0_31, %c0_32] : memref<1x4x2x128xf32, #tpu.memory_space<vmem>>, vector<1x1x2x128xf32>
    %43 = vector.shape_cast %42 : vector<1x1x2x128xf32> to vector<2x128xf32>
    %44 = arith.subf %43, %15 : vector<2x128xf32>
    %45 = math.exp %44 : vector<2x128xf32>
    %46 = arith.addf %38, %45 : vector<2x128xf32>
    %c3_i32 = arith.constant 3 : i32
    %47 = vector.broadcast %c3_i32 : i32 to vector<2x128xi32>
    %48 = arith.cmpi eq, %2, %47 : vector<2x128xi32>
    %49 = arith.select %48, %43, %41 : vector<2x128xi1>, vector<2x128xf32>
    %50 = math.log %46 : vector<2x128xf32>
    %51 = arith.addf %15, %50 : vector<2x128xf32>
    %52 = arith.subf %51, %49 : vector<2x128xf32>
    %cst_33 = arith.constant 0.000000e+00 : f32
    %53 = vector.broadcast %cst_33 : f32 to vector<2x128xf32>
    %54 = arith.select %4, %52, %53 : vector<2x128xi1>, vector<2x128xf32>
    %c0_34 = arith.constant 0 : index
    %c0_35 = arith.constant 0 : index
    %c0_36 = arith.constant 0 : index
    %55 = vector.load %arg4[%c0_34, %c0_35, %c0_36] : memref<1x2x128xf32, #tpu.memory_space<vmem>>, vector<1x2x128xf32>
    %56 = vector.shape_cast %55 : vector<1x2x128xf32> to vector<2x128xf32>
    %57 = vector.shape_cast %54 : vector<2x128xf32> to vector<1x2x128xf32>
    tpu.vector_store %arg4[%c0_34, %c0_35, %c0_36], %57 {strides = array<i32>} : memref<1x2x128xf32, #tpu.memory_space<vmem>>, vector<1x2x128xf32>,
    %cst_37 = arith.constant 0.356674939 : f32
    %58 = vector.broadcast %cst_37 : f32 to vector<2x128xf32>
    %59 = arith.cmpf ogt, %54, %58 : vector<2x128xf32>
    %60 = arith.extui %4 : vector<2x128xi1> to vector<2x128xi32>
    %61 = arith.sitofp %60 : vector<2x128xi32> to vector<2x128xf32>
    %62 = arith.addf %0, %61 : vector<2x128xf32>
    %63 = arith.extui %59 : vector<2x128xi1> to vector<2x128xi32>
    %64 = arith.sitofp %63 : vector<2x128xi32> to vector<2x128xf32>
    %65 = arith.addf %0, %64 : vector<2x128xf32>
    %cst_38 = arith.constant 0.000000e+00 : f32
    %66 = vector.broadcast %cst_38 : f32 to vector<2x128xf32>
    %67 = arith.select %59, %54, %66 : vector<2x128xi1>, vector<2x128xf32>
    %68 = arith.addf %0, %67 : vector<2x128xf32>
    %69 = tpu.concatenate %62, %65, %68 in 0 : vector<2x128xf32>, vector<2x128xf32>, vector<2x128xf32> -> vector<6x128xf32>
    %c0_39 = arith.constant 0 : index
    %c0_40 = arith.constant 0 : index
    %c0_41 = arith.constant 0 : index
    %c0_42 = arith.constant 0 : index
    %70 = vector.load %arg5[%c0_39, %c0_40, %c0_41, %c0_42] : memref<1x1x6x128xf32, #tpu.memory_space<vmem>>, vector<1x1x6x128xf32>
    %71 = vector.shape_cast %70 : vector<1x1x6x128xf32> to vector<6x128xf32>
    %72 = vector.shape_cast %69 : vector<6x128xf32> to vector<1x1x6x128xf32>
    tpu.vector_store %arg5[%c0_39, %c0_40, %c0_41, %c0_42], %72 {strides = array<i32>} : memref<1x1x6x128xf32, #tpu.memory_space<vmem>>, vector<1x1x6x128xf32>,
    return
  }
  func.func @transform_0(%arg0: i32, %arg1: i32) -> (i32, i32, i32, i32) {
    %c0_i32 = arith.constant 0 : i32
    %c0_i32_0 = arith.constant 0 : i32
    %c0_i32_1 = arith.constant 0 : i32
    return %arg1, %c0_i32, %arg0, %c0_i32_0 : i32, i32, i32, i32
  }
  func.func @transform_1(%arg0: i32, %arg1: i32) -> (i32, i32, i32) {
    %c0_i32 = arith.constant 0 : i32
    %c0_i32_0 = arith.constant 0 : i32
    return %arg1, %arg0, %c0_i32 : i32, i32, i32
  }
  func.func @transform_2(%arg0: i32, %arg1: i32) -> (i32, i32, i32) {
    %c0_i32 = arith.constant 0 : i32
    %c0_i32_0 = arith.constant 0 : i32
    return %arg1, %arg0, %c0_i32 : i32, i32, i32
  }
  func.func @transform_3(%arg0: i32, %arg1: i32) -> (i32, i32, i32, i32) {
    %c0_i32 = arith.constant 0 : i32
    %c0_i32_0 = arith.constant 0 : i32
    %c0_i32_1 = arith.constant 0 : i32
    return %arg1, %arg0, %c0_i32, %c0_i32_0 : i32, i32, i32, i32
  }
}

</mosaic_0001>

<bundles_post_ra>
// kernel: tpu_custom_call.1
= control target key start
LH: loop header
LB: loop body
LE: loop exit
PB: predicated region body
PF: predicated region fallthrough
CT: control target
= control target key end

     0   :  { %9 = vsyncpa [#allocation3], 0  ;;  %s996_s0 = inlined_call_operand.hbm [shape: f32[2,4,2,128], index: 0, kind: input, shape index: {}]   ;;  %s997_s1 = inlined_call_operand.hbm [shape: s32[2,2,128], index: 1, kind: input, shape index: {}]   ;;  %s998_s2 = inlined_call_operand.hbm [shape: f32[2,2,128], index: 2, kind: output, shape index: {0}]   ;;  %s999_s3 = inlined_call_operand.vmem [shape: f32[2,1,6,128], index: 3, kind: output, shape index: {1}]  }
   0x1   :  { %11 = vsyncpa [#allocation3 + $0x1], 0 }
   0x2   :  { %12 = vsyncpa [#allocation6], 0 }
   0x3   :  { %14 = vsyncpa [#allocation6 + $0x1], 0 }
   0x4   :  { %15 = vsyncpa [#allocation4], 0 }
   0x5   :  { %17 = vsyncpa [#allocation4 + $0x1], 0  ;;  %s766_s12 = smov 0   ;;  %s768_s13 = smov 0  }
   0x6   :  { %s770_s14 = smov 0   ;;  %s772_s15 = smov 0  }
   0x7   :  { %s774_s16 = smov 0   ;;  %s776_s17 = smov 0  }
   0x8 LB: > { %s488_s18 = sadd.s32 4294967295, %s738_s17   ;;  %s489_s19 = sadd.s32 4294967294, %s738_s17   ;;  %s738_s17 = sphi %s776_s17, %s23_s17   ;;  %s734_s16 = sphi %s774_s16, %s1018_s16   ;;  %s730_s15 = sphi %s772_s15, %s1017_s15   ;;  %s726_s14 = sphi %s770_s14, %s1016_s14   ;;  %s722_s13 = sphi %s768_s13, %s1015_s13   ;;  %s718_s12 = sphi %s766_s12, %s1014_s12  }
   0x9   : > { %s32_s20 = sadd.s32 1, %s734_s16  ;;  %s44_s21 = sadd.s32 1, %s726_s14 }
   0xa   : > { %p33_p0 = scmp.ge.s32.totalorder %s32_s20, 2  ;;  %p51_p1 = scmp.ne.s32.totalorder %s726_s14, %s722_s13 }
   0xb   : > { %p52_p2 = scmp.eq.s32.totalorder %s738_s17, 0  ;;  %p57_p3 = scmp.ne.s32.totalorder %s722_s13, %s718_s12 }
   0xc   : > { %s1020_s20 = smov (%p33_p0, %s32_s20), 0  ;;  %p58_p5 = scmp.eq.s32.totalorder %s488_s18, 0 }
   0xd   : > { %p807_p4 = por %p52_p2, %p51_p1  ;;  %s39_s23 = ssub.s32 %s734_s16, %s1020_s20 }
   0xe   : > { %p111_p6 = scmp.eq.s32.totalorder %s488_s18, 1  ;;  %p42_p7 = scmp.eq.s32.totalorder %s39_s23, 0 }
   0xf   : > { %p813_p8 = por %p58_p5, %p57_p3  ;;  %p117_p10 = scmp.eq.s32.totalorder %s489_s19, 1 }
  0x10   : > { %p817_p9 = por %p111_p6, %p51_p1  ;;  %p529_p13 = scmp.lt.s32.totalorder %s738_s17, 2 }
  0x11   : > { %s1003_s24 = scalar_select %p813_p8, 1, 0 }
  0x12   : > { %s1004_s25 = scalar_select %p817_p9, 1, 0 }
  0x13   : > { %s822_s26 = scalar_select %p42_p7, %s726_s14, %s44_s21  }
  0x14   : > { %p824_p11 = por %p117_p10, %p57_p3  ;;  %s831_s28 = sand.u32 1, %s726_s14  }
  0x15   : > { %s492_s29 = sshll.u32 %s831_s28, 3  ;;  %s511_s30 = sshll.u32 %s734_s16, 7 }
  0x16   : > { %s1005_s27 = scalar_select %p824_p11, 1, 0 }
  0x17   : > { %s838_s6 = scalar_lea.hbm %s996_s0, %s511_s30  ;;  %s169_s7 = scalar_lea.vmem [#allocation2], %s492_s29 }
  0x18   : > { %s177_s8 = sshll.u32 %s169_s7, 4  ;;  %p844_p0 = pnand %p529_p13, %p807_p4  ;;  %s840_s8 = int_to_ptr.vmem [resolvable:$true] %s177_s8 }
  0x19   : > { %s166_s10 = scalar_lea.sflag [#allocation3], %s831_s28  ;;  %s592_s11 = scalar_lea.hbm %s838_s6, 128 }
  0x1a   : > { %p593_p2 = scmp.ne.s32.totalorder %s838_s6, %s592_s11  ;;  %p594_p3 = pneg %p844_p0 }
  0x1b   : > { %s597_s21 = scalar_lea.hbm %s996_s0, 256  ;;  %p598_p4 = scmp.lt.u32.totalorder %s838_s6, %s996_s0 }
  0x1c   : > { %p595_p5 = pnand %p594_p3, %p593_p2  ;;  %p599_p7 = scmp.lt.u32.totalorder %s597_s21, %s592_s11 }
  0x1d   : > { %p601_p13 = scmp.lt.u32.totalorder %s592_s11, %s838_s6 }
  0x1e   : > { %p596_p6 = pneg %p595_p5  ;;  %p600_p10 = por %p599_p7, %p598_p4 }
  0x20   : > { %p602_p12 = por %p601_p13, %p600_p10 }
  0x22   : > { %p603_p1 = pnand %p602_p12, %p596_p6 }
  0x24   : > { %606 = shalt.err (!%p603_p1)
}
  0x25   : > { %s607_s29 = scalar_lea.vmem %s840_s8, 128  ;;  %s740_s30 = smov [#allocation2]  }
  0x26   : > { %p608_p2 = scmp.ne.s32.totalorder %s840_s8, %s607_s29  ;;  %s612_s4 = sshll.u32 %s740_s30, 4  ;;  %s613_s4 = int_to_ptr.vmem [resolvable:$false] %s612_s4 }
  0x27   : > { %s614_s5 = scalar_lea.vmem %s613_s4, 256  ;;  %p615_p9 = scmp.lt.s32.totalorder %s840_s8, %s613_s4 }
  0x28   : > { %p610_p5 = pnand %p608_p2, %p594_p3  ;;  %p616_p4 = scmp.lt.s32.totalorder %s614_s5, %s607_s29 }
  0x2a   : > { %p611_p11 = pneg %p610_p5  ;;  %p617_p7 = por %p616_p4, %p615_p9 }
  0x2c   : > { %p618_p10 = pnand %p617_p7, %p611_p11 }
  0x2e   : > { %621 = shalt.err (!%p618_p10)
}
  0x2f   : > { %s741_s7 = smov 32   ;;  %s742_s11 = smov 2  }
  0x30   : > { %521 = dma.hbm_to_vmem [thread:$0]  (!%p844_p0), %s838_s6, 128, %s840_s8, %s166_s10, %s741_s7, %s741_s7, %s742_s11  }
  0x31   : > { %p204_p12 = scmp.lt.s32.totalorder %s738_s17, 3  ;;  %s495_s18 = sshll.u32 %s831_s28, 1 }
  0x32   : > { %s496_s19 = sshll.u32 %s734_s16, 5  ;;  %p1007_p9 = scmp.ge.s32.totalorder %s738_s17, 1 }
  0x33   : > { %s889_s29 = scalar_lea.hbm %s997_s1, %s496_s19  ;;  %s191_s30 = scalar_lea.vmem [#allocation5], %s495_s18 }
  0x34   : > { %p882_p11 = pnand %p1007_p9, %p204_p12  ;;  %s199_s4 = sshll.u32 %s191_s30, 4  ;;  %s200_s4 = int_to_ptr.vmem [resolvable:$true] %s199_s4 }
  0x35   : > { %s188_s6 = scalar_lea.sflag [#allocation6], %s831_s28  ;;  %s622_s8 = scalar_lea.hbm %s889_s29, 32 }
  0x36   : > { %s1008_s21 = scalar_select %p882_p11, 1, 0 }
  0x37   : > { %p623_p1 = scmp.ne.s32.totalorder %s889_s29, %s622_s8  ;;  %s627_s7 = scalar_lea.hbm %s997_s1, 64 }
  0x38   : > { %p628_p2 = scmp.lt.u32.totalorder %s889_s29, %s997_s1  ;;  %p629_p5 = scmp.lt.u32.totalorder %s627_s7, %s622_s8 }
  0x39   : > { %p625_p6 = pnand %p623_p1, %p594_p3  ;;  %p631_p7 = scmp.lt.u32.totalorder %s622_s8, %s889_s29 }
  0x3a   : > { %p630_p4 = por %p629_p5, %p628_p2 }
  0x3b   : > { %p626_p13 = pneg %p625_p6 }
  0x3c   : > { %p632_p10 = por %p631_p7, %p630_p4 }
  0x3e   : > { %p633_p12 = pnand %p632_p10, %p626_p13 }
  0x40   : > { %636 = shalt.err (!%p633_p12)
}
  0x41   : > { %s637_s28 = scalar_lea.vmem %s200_s4, 32  ;;  %s743_s18 = smov [#allocation5]  }
  0x42   : > { %p638_p9 = scmp.ne.s32.totalorder %s200_s4, %s637_s28  ;;  %s642_s22 = sshll.u32 %s743_s18, 4  ;;  %s643_s22 = int_to_ptr.vmem [resolvable:$false] %s642_s22 }
  0x43   : > { %s644_s23 = scalar_lea.vmem %s643_s22, 64  ;;  %p645_p8 = scmp.lt.s32.totalorder %s200_s4, %s643_s22 }
  0x44   : > { %p640_p1 = pnand %p638_p9, %p594_p3  ;;  %p646_p11 = scmp.lt.s32.totalorder %s644_s23, %s637_s28 }
  0x46   : > { %p641_p6 = pneg %p640_p1  ;;  %p647_p2 = por %p646_p11, %p645_p8 }
  0x48   : > { %p648_p5 = pnand %p647_p2, %p641_p6 }
  0x4a   : > { %651 = shalt.err (!%p648_p5)
}
  0x4b   : > { %524 = dma.hbm_to_vmem [thread:$0]  (!%p844_p0), %s889_s29, 32, %s200_s4, %s188_s6  }
  0x4c   : > { %p1009_p13 = scmp.ne.s32.totalorder %s1008_s21, 0 }
  0x4d   : > { %s914_s30 = sand.u32 (!%p1009_p13), 1, %s722_s13   ;;  %p1010_p3 = scmp.ne.s32.totalorder (!%p1009_p13), %s1003_s24, 0 }
  0x4e   : > { %208 = sbr.rel (%p1009_p13) target bundleno = 155 (0x9b), region = 28  ;;  %s498_s8 = sshll.u32 (!%p1009_p13), %s914_s30, 3 }
  0x4f   : > { %s211_s10 = scalar_lea.sflag (!%p1009_p13), [#allocation3], %s914_s30  ;;  %s214_s5 = scalar_lea.vmem (!%p1009_p13), [#allocation2], %s498_s8 }
  0x55   : > { %705 = dma.done.wait (%p1010_p3), %s211_s10, 128  }
  0x56   : > { %707 = vsyncadd (%p1010_p3), %s211_s10, 4294967168  ;;  %s499_s9 = sshll.u32 %s914_s30, 1  ;;  %s220_s21 = scalar_lea.sflag [#allocation6], %s914_s30 }
  0x57   : > { %s223_s29 = scalar_lea.vmem [#allocation5], %s499_s9 }
  0x58   : > { %709 = dma.done.wait (%p1010_p3), %s220_s21, 32  }
  0x59   : > { %711 = vsyncadd (%p1010_p3), %s220_s21, 4294967264  ;;  %v267_v0 = vld [vmem:[%s214_s5] sm:$0x3]  ;;  %v502_v1 = vld [vmem:[%s214_s5 + $0x2] sm:$0x3]  ;;  %p258_p8 = scmp.lt.s32.totalorder %s730_s15, 1 }
  0x5a   : > { %v270_v2 = vmax.f32 %v267_v0, %v502_v1  ;;  %v503_v3 = vld [vmem:[%s214_s5 + $0x4] sm:$0x3]  ;;  %v504_v4 = vld [vmem:[%s214_s5 + $0x6] sm:$0x3]  ;;  %v265_v21 = vld [vmem:[%s223_s29] sm:$0x3] }
  0x5b   : > { %vm281_vm0 = vcmp.eq.s32.totalorder %v265_v21, 0  ;;  %vm287_vm1 = vcmp.eq.s32.totalorder %v265_v21, 1  ;;  %vm293_vm2 = vcmp.eq.s32.totalorder %v265_v21, 2  ;;  %vm299_vm3 = vcmp.eq.s32.totalorder %v265_v21, 3  ;;  %s248_s24 = scalar_lea.vmem [#allocation7], %s499_s9  ;;  %s508_s6 = sshll.u32 %s730_s15, 5 }
  0x5c   : > { %v273_v5 = vmax.f32 %v270_v2, %v503_v3  ;;  %v282_v23 = vsel %vm281_vm0, %v267_v0, 0.0  ;;  %s349_s4 = sshll.u32 %s248_s24, 4  ;;  %vm266_vm4 = vcmp.ne.s32.totalorder %v265_v21, 255  ;;  %s1022_s15 = smov (!%p258_p8, %s730_s15), 1  ;;  %v744_v32 = vmov 0.0   ;;  %s937_s4 = int_to_ptr.vmem [resolvable:$true] %s349_s4 }
  0x5d   : > { %v288_v24 = vsel %vm287_vm1, %v502_v1, %v282_v23  ;;  %s942_s19 = scalar_lea.hbm %s998_s2, %s508_s6  ;;  %s501_s28 = sshll.u32 %s1022_s15, 3  ;;  %v505_v33 = vsel %vm266_vm4, 1.0, %v744_v32  ;;  %vm322_vm6 = vcmask 1041408  }
  0x5e   : > { %v276_v6 = vmax.f32 %v273_v5, %v504_v4  ;;  %v294_v25 = vsel %vm293_vm2, %v503_v3, %v288_v24  ;;  %s328_s18 = scalar_lea.sflag [#allocation4], %s914_s30  ;;  %s652_s22 = scalar_lea.vmem %s937_s4, 32 }
  0x5f   : > { %v300_v28 = vsel %vm299_vm3, %v504_v4, %v294_v25  ;;  %p653_p0 = scmp.ne.s32.totalorder %s937_s4, %s652_s22  ;;  %p1011_p11 = scmp.ne.s32.totalorder %s1004_s25, 0 }
  0x60   : > { %v277_v7 = vsub.f32 %v267_v0, %v276_v6  ;;  %v283_v8 = vsub.f32 %v502_v1, %v276_v6  ;;  %v289_v9 = vsub.f32 %v503_v3, %v276_v6  ;;  %v295_v10 = vsub.f32 %v504_v4, %v276_v6  ;;  %s745_s23 = smov [#allocation7]  }
  0x61   : > { %p654_p4 = pnand %p653_p0, %p1011_p11  ;;  %s656_s8 = sshll.u32 %s745_s23, 4  ;;  %s657_s8 = int_to_ptr.vmem [resolvable:$false] %s656_s8 }
  0x62   : > { %v278_v11 = vmul.f32 1.442695, %v277_v7  ;;  %v284_v12 = vmul.f32 1.442695, %v283_v8  ;;  %v290_v13 = vmul.f32 1.442695, %v289_v9  ;;  %p659_p10 = scmp.lt.s32.totalorder %s937_s4, %s657_s8 }
  0x63   : > { %v296_v14 = vmul.f32 1.442695, %v295_v10  ;;  %p655_p7 = pneg %p654_p4  ;;  %s658_s10 = scalar_lea.vmem %s657_s8, 64 }
  0x64   : > { %582 = vpow2.f32 %v278_v11  ;;  %p660_p12 = scmp.lt.s32.totalorder %s658_s10, %s652_s22 }
  0x65   : > { %584 = vpow2.f32 %v284_v12 }
  0x66   : > { %586 = vpow2.f32 %v290_v13  ;;  %p661_p9 = por %p660_p12, %p659_p10 }
  0x67   : > { %588 = vpow2.f32 %v296_v14 }
  0x68   : > { %p662_p1 = pnand %p661_p9, %p655_p7 }
  0x6e   : > { %v583_v15 = vpop.eup %582 }
  0x6f   : > { %v585_v16 = vpop.eup %584 }
  0x70   : > { %v587_v17 = vpop.eup %586  ;;  %v286_v18 = vadd.f32 %v585_v16, %v583_v15 }
  0x71   : > { %v589_v19 = vpop.eup %588 }
  0x72   : > { %v292_v20 = vadd.f32 %v587_v17, %v286_v18 }
  0x74   : > { %v298_v22 = vadd.f32 %v589_v19, %v292_v20 }
  0x76   : > { %590 = vlog2.f32 %v298_v22 }
  0x80   : > { %v591_v26 = vpop.eup %590 }
  0x81   : > { %v302_v27 = vmul.f32 0.6931472, %v591_v26 }
  0x83   : > { %v303_v29 = vadd.f32 %v302_v27, %v276_v6 }
  0x85   : > { %v304_v30 = vsub.f32 %v303_v29, %v300_v28 }
  0x87   : > { %v305_v31 = vsel %vm266_vm4, %v304_v30, 0.0 }
  0x88   : > { %306 = vst [vmem:[%s248_s24] sm:$0x3] %v305_v31  ;;  %vm307_vm5 = vcmp.gt.f32.partialorder %v305_v31, 0.35667494 }
  0x89   : > { %v506_v34 = vsel %vm307_vm5, 1.0, %v744_v32  ;;  %v314_v35 = vsel %vm307_vm5, %v305_v31, 0.0 }
  0x8a   : > { %665 = shalt.err (!%p662_p1)
}
  0x8b   : > { %s666_s30 = scalar_lea.hbm %s942_s19, 32  ;;  %s670_s21 = scalar_lea.hbm %s998_s2, 64 }
  0x8c   : > { %p667_p6 = scmp.ne.s32.totalorder %s942_s19, %s666_s30  ;;  %p671_p13 = scmp.lt.u32.totalorder %s942_s19, %s998_s2 }
  0x8d   : > { %p672_p3 = scmp.lt.u32.totalorder %s670_s21, %s666_s30  ;;  %p674_p0 = scmp.lt.u32.totalorder %s666_s30, %s942_s19 }
  0x8e   : > { %p668_p2 = pnand %p667_p6, %p1011_p11 }
  0x8f   : > { %p673_p8 = por %p672_p3, %p671_p13 }
  0x90   : > { %p669_p5 = pneg %p668_p2 }
  0x91   : > { %p675_p4 = por %p674_p0, %p673_p8 }
  0x93   : > { %p676_p7 = pnand %p675_p4, %p669_p5 }
  0x95   : > { %679 = shalt.err (!%p676_p7)
}
  0x96   : > { %516 = dma.vmem_to_hbm [thread:$0]  (%p1011_p11), %s937_s4, 32, %s942_s19, %s328_s18   ;;  %v317_v36 = vrot.slane %v506_v34, 6  ;;  %v320_v37 = vrot.slane %v314_v35, 4  ;;  %vm324_vm7 = vcmask 1043456  }
  0x97   : > { %s264_s11 = scalar_lea.vmem %s999_s3, %s501_s28 }
  0x98   : > { %v323_v38 = vsel %vm322_vm6, %v505_v33, %v317_v36 }
  0x99   : > { %v325_v39 = vsel %vm324_vm7, %v323_v38, %v320_v37 }
  0x9a   : > { %326 = vst [vmem:[%s264_s11] sm:$0x3f] %v325_v39 }
  0x9b PF: > { %s364_s25 = sand.u32 1, %s718_s12   ;;  %p1012_p10 = scmp.ne.s32.totalorder %s1005_s27, 0 }
  0x9c   : > { %p1013_p12 = scmp.ge.s32.totalorder %s738_s17, 2  ;;  %s365_s4 = scalar_lea.sflag [#allocation4], %s364_s25 }
  0x9e   : > { %p526_p11 = pnand %p1013_p12, %p1012_p10 }
  0xa0   : > { %713 = dma.done.wait (!%p526_p11), %s365_s4, 32  }
  0xa1   : > { %715 = vsyncadd (!%p526_p11), %s365_s4, 4294967264  ;;  %s23_s17 = sadd.s32 1, %s738_s17   ;;  %s1014_s12 = smov %s722_s13 }
  0xa2   : > { %p20_p9 = scmp.ge.s32.totalorder %s23_s17, 4   ;;  %s1015_s13 = smov %s726_s14 }
  0xa3   : > { %s1016_s14 = smov %s822_s26  ;;  %s1017_s15 = smov %s734_s16 }
  0xa4   : > { %s1018_s16 = smov %s1020_s20  ;;  %22 = sbr.rel (!%p20_p9) target bundleno = 8 (0x8), region = 101 }
  0xab   :  { %380 = vsyncpa [#allocation3], 1 }
  0xac   :  { %382 = vsyncpa [#allocation3 + $0x1], 1 }
  0xad   :  { %383 = vsyncpa [#allocation6], 1 }
  0xae   :  { %385 = vsyncpa [#allocation6 + $0x1], 1 }
  0xaf   :  { %386 = vsyncpa [#allocation4], 1 }
  0xb0   :  { %388 = vsyncpa [#allocation4 + $0x1], 1 }

</bundles_post_ra>
